<compile_context>
chip_gen: v7x
topology: tpu7x:2x2x1
jax: 0.10.0
libtpu: 0.0.40
codegen_flags: <defaults>
</compile_context>

<pallas_src>
import math

import jax
import jax.numpy as jnp
from jax.experimental import pallas as pl
from jax.experimental.pallas import tpu as pltpu

_INV_SQRT2 = 1.0 / math.sqrt(2.0)


def _make_kernel(eps: float):
    def kernel(x_ref, w_ref, b_ref, g_ref, beta_ref, o_ref):
        # Dense: x @ W^T + b. Feed native-dtype tiles to the MXU, accumulate in f32
        # (no materialized f32 copies of x or the resident weight).
        h = jnp.dot(x_ref[...], w_ref[...], preferred_element_type=jnp.float32)
        h = h + b_ref[...].astype(jnp.float32)

        # Exact ("erf") GELU, matching ACT2FN["gelu"] / torch.nn.functional.gelu.
        h = 0.5 * h * (1.0 + jax.lax.erf(h * _INV_SQRT2))

        # LayerNorm over the hidden (lane) axis, biased variance like torch.
        # Single traversal (sum and sum-of-squares); affine folded into one fused scale.
        inv_h = 1.0 / h.shape[-1]
        mean = jnp.sum(h, axis=-1, keepdims=True) * inv_h
        msq = jnp.sum(h * h, axis=-1, keepdims=True) * inv_h
        var = jnp.maximum(msq - mean * mean, 0.0)
        scale = g_ref[...].astype(jnp.float32) * jax.lax.rsqrt(var + eps)
        out = (h - mean) * scale + beta_ref[...].astype(jnp.float32)

        o_ref[...] = out.astype(o_ref.dtype)

    return kernel


def _round_up(x: int, m: int) -> int:
    return ((x + m - 1) // m) * m


def _vmem_bytes_estimate(tm: int, H: int, x_dtype, w_dtype, out_dtype) -> int:
    """Worst-case VMEM footprint (everything double-buffered) plus f32 temporaries."""
    isz = lambda dt: jnp.dtype(dt).itemsize
    w = 2 * H * H * isz(w_dtype)           # resident W^T (worst case: 2 buffers)
    x = 2 * tm * H * isz(x_dtype)          # double-buffered input tile
    o = 2 * tm * H * isz(out_dtype)        # double-buffered output tile
    vecs = 3 * 2 * H * 4                   # bias / gamma / beta
    tmps = 4 * tm * H * 4                  # f32 matmul result + GELU/LN temporaries (rough)
    return w + x + o + vecs + tmps


def _choose_row_tile(M: int, H: int, row_tile: int, x_dtype, w_dtype, out_dtype,
                     vmem_budget: int) -> int:
    tm = max(8, min(_round_up(row_tile, 8), _round_up(M, 8)))
    # Keep >= 2 grid steps when possible so the "parallel" axis can actually shard
    # across both v7x TensorCores (a 1-step grid leaves one TC idle).
    if M > 8 and pl.cdiv(M, tm) < 2:
        tm = max(8, _round_up(pl.cdiv(M, 2), 8))
    # Shrink until the tile fits a conservative per-generation VMEM budget
    # (v7x has only 64 MiB VMEM per TensorCore).
    while tm > 8 and _vmem_bytes_estimate(tm, H, x_dtype, w_dtype, out_dtype) > vmem_budget:
        tm = max(8, _round_up(tm // 2, 8))
    return tm


def _pallas_forward(x2d, wt, b2d, g2d, beta2d, *, eps, tm, out_dtype,
                    vmem_limit_bytes, single_buffer_consts):
    m_pad, H = x2d.shape
    grid_m = m_pad // tm
    # Constant operands (index_map always (0, 0)) never re-fetch; one buffer is enough.
    const_kwargs = {"pipeline_mode": pl.Buffered(1)} if single_buffer_consts else {}
    return pl.pallas_call(
        _make_kernel(eps),
        out_shape=jax.ShapeDtypeStruct((m_pad, H), out_dtype),
        grid_spec=pltpu.PrefetchScalarGridSpec(
            num_scalar_prefetch=0,
            grid=(grid_m,),
            in_specs=[
                pl.BlockSpec((tm, H), lambda i: (i, 0)),                  # x rows
                pl.BlockSpec((H, H), lambda i: (0, 0), **const_kwargs),   # W^T (resident)
                pl.BlockSpec((1, H), lambda i: (0, 0), **const_kwargs),   # bias
                pl.BlockSpec((1, H), lambda i: (0, 0), **const_kwargs),   # LN gamma
                pl.BlockSpec((1, H), lambda i: (0, 0), **const_kwargs),   # LN beta
            ],
            out_specs=pl.BlockSpec((tm, H), lambda i: (i, 0)),
        ),
        compiler_params=pltpu.CompilerParams(
            dimension_semantics=("parallel",),
            vmem_limit_bytes=vmem_limit_bytes,
        ),
    )(x2d, wt, b2d, g2d, beta2d)


def deberta_prediction_head_transform(hidden_states, weight, bias, ln_gamma, ln_beta,
                                      *, eps=1e-7, row_tile=256, compute_dtype=None):
    """hidden_states: [B, S, H]; weight: [H, H] in PyTorch nn.Linear layout (out, in);
    bias / ln_gamma / ln_beta: [H].  Pass compute_dtype=jnp.bfloat16 to cast x and W once
    in the wrapper and use the MXU's native bf16 path (f32 accumulation in-kernel)."""
    B, S, H = hidden_states.shape
    out_dtype = hidden_states.dtype
    M = B * S
    x2d = hidden_states.reshape(M, H)

    # nn.Linear computes x @ W^T; transpose once in glue so the kernel does x @ Wt.
    wt = weight.T
    if compute_dtype is not None:
        x2d = x2d.astype(compute_dtype)
        wt = wt.astype(compute_dtype)
    b2d = bias.reshape(1, H).astype(jnp.float32)
    g2d = ln_gamma.reshape(1, H).astype(jnp.float32)
    beta2d = ln_beta.reshape(1, H).astype(jnp.float32)

    # Row tile: large enough to feed the 256x256 (v6e/v7x) / 128x128 (v5e) MXU arrays.
    vmem_budget = 40 * 2**20
    tm = _choose_row_tile(M, H, row_tile, x2d.dtype, wt.dtype, out_dtype, vmem_budget)

    # Pad rows to a multiple of the tile (replaces the old hard assert); the zero-padded
    # rows go through the same math (eps keeps LN finite) and are sliced off below.
    grid_m = int(pl.cdiv(M, tm))
    m_pad = grid_m * tm
    if m_pad != M:
        x2d = jnp.pad(x2d, ((0, m_pad - M), (0, 0)))

    est = _vmem_bytes_estimate(tm, H, x2d.dtype, wt.dtype, out_dtype)
    vmem_limit_bytes = int(min(max(1.5 * est, 32 * 2**20), 48 * 2**20))
    # TODO(synk): for very large hidden sizes the resident [H, H] weight should itself be
    # K/N-tiled with an accumulator grid axis instead of being held whole in VMEM.
    # Note: H below a multiple of 128 (toy shapes) takes the masked-store path; real
    # DeBERTa hidden sizes (768/1024/1536) are lane-aligned.

    kwargs = dict(eps=eps, tm=tm, out_dtype=out_dtype, vmem_limit_bytes=vmem_limit_bytes)
    try:
        out2d = _pallas_forward(x2d, wt, b2d, g2d, beta2d,
                                single_buffer_consts=True, **kwargs)
    except Exception:
        # Installed jax rejects pl.Buffered(1): fall back to default double-buffering.
        out2d = _pallas_forward(x2d, wt, b2d, g2d, beta2d,
                                single_buffer_consts=False, **kwargs)

    return out2d[:M].reshape(B, S, H)


def _reference(hidden_states, weight, bias, ln_gamma, ln_beta, eps=1e-7):
    h = jnp.einsum("bsh,oh->bso", hidden_states.astype(jnp.float32),
                   weight.astype(jnp.float32)) + bias
    h = 0.5 * h * (1.0 + jax.lax.erf(h / jnp.sqrt(2.0)))
    mean = jnp.mean(h, axis=-1, keepdims=True)
    var = jnp.mean((h - mean) ** 2, axis=-1, keepdims=True)
    return (h - mean) * jax.lax.rsqrt(var + eps) * ln_gamma + ln_beta


if __name__ == "__main__":
    # Small config consistent with the module: batch=2, seq=8, hidden=32,
    # hidden_act="gelu", layer_norm_eps=1e-7 (DeBERTa-v2 default).
    B, S, H = 2, 8, 32
    eps = 1e-7

    key = jax.random.PRNGKey(0)
    kx, kw, kb, kg, kbeta = jax.random.split(key, 5)

    x = jax.random.normal(kx, (B, S, H), dtype=jnp.float32)
    weight = jax.random.normal(kw, (H, H), dtype=jnp.float32) * 0.05   # Linear weight (out, in)
    bias = jax.random.normal(kb, (H,), dtype=jnp.float32) * 0.01
    ln_gamma = 1.0 + 0.1 * jax.random.normal(kg, (H,), dtype=jnp.float32)
    ln_beta = 0.1 * jax.random.normal(kbeta, (H,), dtype=jnp.float32)

    out = deberta_prediction_head_transform(x, weight, bias, ln_gamma, ln_beta, eps=eps)
    out = jax.block_until_ready(out)

    ref = _reference(x, weight, bias, ln_gamma, ln_beta, eps=eps)
    assert out.shape == (B, S, H)
    assert jnp.max(jnp.abs(out - ref)) < 1e-4, "mismatch vs reference"

    print("KERNEL_OK")
</pallas_src>

<mosaic_0001>
module attributes {stable_mosaic.version = 11 : i64} {
  func.func @kernel(%arg0: i32, %arg1: memref<8x32xf32, #tpu.memory_space<vmem>>, %arg2: memref<32x32xf32, #tpu.memory_space<vmem>>, %arg3: memref<1x32xf32, #tpu.memory_space<vmem>>, %arg4: memref<1x32xf32, #tpu.memory_space<vmem>>, %arg5: memref<1x32xf32, #tpu.memory_space<vmem>>, %arg6: memref<8x32xf32, #tpu.memory_space<vmem>>) attributes {dimension_semantics = [#tpu.dimension_semantics<parallel>], iteration_bounds = array<i64: 2>, scalar_prefetch = 0 : i64, scratch_operands = 0 : i64, tpu.core_type = #tpu.core_type<tc>, window_params = [{transform_indices = @transform_0, window_bounds = array<i64: 8, 32>}, {pipeline_mode = #tpu.pipeline_mode<synchronous>, transform_indices = @transform_1, window_bounds = array<i64: 32, 32>}, {pipeline_mode = #tpu.pipeline_mode<synchronous>, transform_indices = @transform_2, window_bounds = array<i64: 1, 32>}, {pipeline_mode = #tpu.pipeline_mode<synchronous>, transform_indices = @transform_3, window_bounds = array<i64: 1, 32>}, {pipeline_mode = #tpu.pipeline_mode<synchronous>, transform_indices = @transform_4, window_bounds = array<i64: 1, 32>}, {transform_indices = @transform_5, window_bounds = array<i64: 8, 32>}]} {
    %c0 = arith.constant 0 : index
    %c0_0 = arith.constant 0 : index
    %0 = vector.load %arg1[%c0, %c0_0] : memref<8x32xf32, #tpu.memory_space<vmem>>, vector<8x32xf32>
    %c0_1 = arith.constant 0 : index
    %c0_2 = arith.constant 0 : index
    %1 = vector.load %arg2[%c0_1, %c0_2] : memref<32x32xf32, #tpu.memory_space<vmem>>, vector<32x32xf32>
    %cst = arith.constant dense<0.000000e+00> : vector<8x32xf32>
    %2 = tpu.matmul %0, %1, %cst {dimension_numbers = #tpu.dot_dimension_numbers<[1], [0], [0], [1], [0, 0, 1, 1], [], []>} : vector<8x32xf32>, vector<32x32xf32>, vector<8x32xf32> -> vector<8x32xf32>
    %c0_3 = arith.constant 0 : index
    %c0_4 = arith.constant 0 : index
    %3 = vector.load %arg3[%c0_3, %c0_4] : memref<1x32xf32, #tpu.memory_space<vmem>>, vector<1x32xf32>
    %4 = vector.broadcast %3 : vector<1x32xf32> to vector<8x32xf32>
    %5 = arith.addf %2, %4 : vector<8x32xf32>
    %cst_5 = arith.constant 5.000000e-01 : f32
    %6 = vector.broadcast %cst_5 : f32 to vector<8x32xf32>
    %7 = arith.mulf %6, %5 : vector<8x32xf32>
    %cst_6 = arith.constant 0.707106769 : f32
    %8 = vector.broadcast %cst_6 : f32 to vector<8x32xf32>
    %9 = arith.mulf %5, %8 : vector<8x32xf32>
    %10 = math.erf %9 : vector<8x32xf32>
    %cst_7 = arith.constant 1.000000e+00 : f32
    %11 = vector.broadcast %cst_7 : f32 to vector<8x32xf32>
    %12 = arith.addf %11, %10 : vector<8x32xf32>
    %13 = arith.mulf %7, %12 : vector<8x32xf32>
    %cst_8 = arith.constant dense<0.000000e+00> : vector<8xf32>
    %14 = vector.multi_reduction <add>, %13, %cst_8 [1] : vector<8x32xf32> to vector<8xf32>
    %15 = vector.shape_cast %14 : vector<8xf32> to vector<8x1xf32>
    %cst_9 = arith.constant 3.125000e-02 : f32
    %16 = vector.broadcast %cst_9 : f32 to vector<8x1xf32>
    %17 = arith.mulf %15, %16 : vector<8x1xf32>
    %18 = arith.mulf %13, %13 : vector<8x32xf32>
    %cst_10 = arith.constant dense<0.000000e+00> : vector<8xf32>
    %19 = vector.multi_reduction <add>, %18, %cst_10 [1] : vector<8x32xf32> to vector<8xf32>
    %20 = vector.shape_cast %19 : vector<8xf32> to vector<8x1xf32>
    %cst_11 = arith.constant 3.125000e-02 : f32
    %21 = vector.broadcast %cst_11 : f32 to vector<8x1xf32>
    %22 = arith.mulf %20, %21 : vector<8x1xf32>
    %23 = arith.mulf %17, %17 : vector<8x1xf32>
    %24 = arith.subf %22, %23 : vector<8x1xf32>
    %cst_12 = arith.constant 0.000000e+00 : f32
    %25 = vector.broadcast %cst_12 : f32 to vector<8x1xf32>
    %26 = arith.maximumf %24, %25 : vector<8x1xf32>
    %c0_13 = arith.constant 0 : index
    %c0_14 = arith.constant 0 : index
    %27 = vector.load %arg4[%c0_13, %c0_14] : memref<1x32xf32, #tpu.memory_space<vmem>>, vector<1x32xf32>
    %cst_15 = arith.constant 1.000000e-07 : f32
    %28 = vector.broadcast %cst_15 : f32 to vector<8x1xf32>
    %29 = arith.addf %26, %28 : vector<8x1xf32>
    %30 = math.rsqrt %29 : vector<8x1xf32>
    %31 = vector.broadcast %27 : vector<1x32xf32> to vector<8x32xf32>
    %32 = vector.broadcast %30 : vector<8x1xf32> to vector<8x32xf32>
    %33 = arith.mulf %31, %32 : vector<8x32xf32>
    %34 = vector.broadcast %17 : vector<8x1xf32> to vector<8x32xf32>
    %35 = arith.subf %13, %34 : vector<8x32xf32>
    %36 = arith.mulf %35, %33 : vector<8x32xf32>
    %c0_16 = arith.constant 0 : index
    %c0_17 = arith.constant 0 : index
    %37 = vector.load %arg5[%c0_16, %c0_17] : memref<1x32xf32, #tpu.memory_space<vmem>>, vector<1x32xf32>
    %38 = vector.broadcast %37 : vector<1x32xf32> to vector<8x32xf32>
    %39 = arith.addf %36, %38 : vector<8x32xf32>
    %c0_18 = arith.constant 0 : index
    %c0_19 = arith.constant 0 : index
    %40 = vector.load %arg6[%c0_18, %c0_19] : memref<8x32xf32, #tpu.memory_space<vmem>>, vector<8x32xf32>
    tpu.vector_store %arg6[%c0_18, %c0_19], %39 {strides = array<i32>} : memref<8x32xf32, #tpu.memory_space<vmem>>, vector<8x32xf32>,
    return
  }
  func.func @transform_0(%arg0: i32) -> (i32, i32) {
    %c0_i32 = arith.constant 0 : i32
    %c0_i32_0 = arith.constant 0 : i32
    return %arg0, %c0_i32 : i32, i32
  }
  func.func @transform_1(%arg0: i32) -> (i32, i32) {
    %c0_i32 = arith.constant 0 : i32
    %c0_i32_0 = arith.constant 0 : i32
    %c0_i32_1 = arith.constant 0 : i32
    return %c0_i32, %c0_i32_0 : i32, i32
  }
  func.func @transform_2(%arg0: i32) -> (i32, i32) {
    %c0_i32 = arith.constant 0 : i32
    %c0_i32_0 = arith.constant 0 : i32
    %c0_i32_1 = arith.constant 0 : i32
    return %c0_i32, %c0_i32_0 : i32, i32
  }
  func.func @transform_3(%arg0: i32) -> (i32, i32) {
    %c0_i32 = arith.constant 0 : i32
    %c0_i32_0 = arith.constant 0 : i32
    %c0_i32_1 = arith.constant 0 : i32
    return %c0_i32, %c0_i32_0 : i32, i32
  }
  func.func @transform_4(%arg0: i32) -> (i32, i32) {
    %c0_i32 = arith.constant 0 : i32
    %c0_i32_0 = arith.constant 0 : i32
    %c0_i32_1 = arith.constant 0 : i32
    return %c0_i32, %c0_i32_0 : i32, i32
  }
  func.func @transform_5(%arg0: i32) -> (i32, i32) {
    %c0_i32 = arith.constant 0 : i32
    %c0_i32_0 = arith.constant 0 : i32
    return %arg0, %c0_i32 : i32, i32
  }
}

module attributes {stable_mosaic.version = 11 : i64} {
  func.func @kernel(%arg0: i32, %arg1: memref<8x32xf32, #tpu.memory_space<vmem>>, %arg2: memref<32x32xf32, #tpu.memory_space<vmem>>, %arg3: memref<1x32xf32, #tpu.memory_space<vmem>>, %arg4: memref<1x32xf32, #tpu.memory_space<vmem>>, %arg5: memref<1x32xf32, #tpu.memory_space<vmem>>, %arg6: memref<8x32xf32, #tpu.memory_space<vmem>>) attributes {dimension_semantics = [#tpu.dimension_semantics<parallel>], iteration_bounds = array<i64: 2>, scalar_prefetch = 0 : i64, scratch_operands = 0 : i64, tpu.core_type = #tpu.core_type<tc>, window_params = [{transform_indices = @transform_0, window_bounds = array<i64: 8, 32>}, {pipeline_mode = #tpu.pipeline_mode<synchronous>, transform_indices = @transform_1, window_bounds = array<i64: 32, 32>}, {pipeline_mode = #tpu.pipeline_mode<synchronous>, transform_indices = @transform_2, window_bounds = array<i64: 1, 32>}, {pipeline_mode = #tpu.pipeline_mode<synchronous>, transform_indices = @transform_3, window_bounds = array<i64: 1, 32>}, {pipeline_mode = #tpu.pipeline_mode<synchronous>, transform_indices = @transform_4, window_bounds = array<i64: 1, 32>}, {transform_indices = @transform_5, window_bounds = array<i64: 8, 32>}]} {
    %c0 = arith.constant 0 : index
    %c0_0 = arith.constant 0 : index
    %0 = vector.load %arg1[%c0, %c0_0] : memref<8x32xf32, #tpu.memory_space<vmem>>, vector<8x32xf32>
    %c0_1 = arith.constant 0 : index
    %c0_2 = arith.constant 0 : index
    %1 = vector.load %arg2[%c0_1, %c0_2] : memref<32x32xf32, #tpu.memory_space<vmem>>, vector<32x32xf32>
    %cst = arith.constant dense<0.000000e+00> : vector<8x32xf32>
    %2 = tpu.matmul %0, %1, %cst {dimension_numbers = #tpu.dot_dimension_numbers<[1], [0], [0], [1], [0, 0, 1, 1], [], []>} : vector<8x32xf32>, vector<32x32xf32>, vector<8x32xf32> -> vector<8x32xf32>
    %c0_3 = arith.constant 0 : index
    %c0_4 = arith.constant 0 : index
    %3 = vector.load %arg3[%c0_3, %c0_4] : memref<1x32xf32, #tpu.memory_space<vmem>>, vector<1x32xf32>
    %4 = vector.broadcast %3 : vector<1x32xf32> to vector<8x32xf32>
    %5 = arith.addf %2, %4 : vector<8x32xf32>
    %cst_5 = arith.constant 5.000000e-01 : f32
    %6 = vector.broadcast %cst_5 : f32 to vector<8x32xf32>
    %7 = arith.mulf %6, %5 : vector<8x32xf32>
    %cst_6 = arith.constant 0.707106769 : f32
    %8 = vector.broadcast %cst_6 : f32 to vector<8x32xf32>
    %9 = arith.mulf %5, %8 : vector<8x32xf32>
    %10 = math.erf %9 : vector<8x32xf32>
    %cst_7 = arith.constant 1.000000e+00 : f32
    %11 = vector.broadcast %cst_7 : f32 to vector<8x32xf32>
    %12 = arith.addf %11, %10 : vector<8x32xf32>
    %13 = arith.mulf %7, %12 : vector<8x32xf32>
    %cst_8 = arith.constant dense<0.000000e+00> : vector<8xf32>
    %14 = vector.multi_reduction <add>, %13, %cst_8 [1] : vector<8x32xf32> to vector<8xf32>
    %15 = vector.shape_cast %14 : vector<8xf32> to vector<8x1xf32>
    %cst_9 = arith.constant 3.125000e-02 : f32
    %16 = vector.broadcast %cst_9 : f32 to vector<8x1xf32>
    %17 = arith.mulf %15, %16 : vector<8x1xf32>
    %18 = arith.mulf %13, %13 : vector<8x32xf32>
    %cst_10 = arith.constant dense<0.000000e+00> : vector<8xf32>
    %19 = vector.multi_reduction <add>, %18, %cst_10 [1] : vector<8x32xf32> to vector<8xf32>
    %20 = vector.shape_cast %19 : vector<8xf32> to vector<8x1xf32>
    %cst_11 = arith.constant 3.125000e-02 : f32
    %21 = vector.broadcast %cst_11 : f32 to vector<8x1xf32>
    %22 = arith.mulf %20, %21 : vector<8x1xf32>
    %23 = arith.mulf %17, %17 : vector<8x1xf32>
    %24 = arith.subf %22, %23 : vector<8x1xf32>
    %cst_12 = arith.constant 0.000000e+00 : f32
    %25 = vector.broadcast %cst_12 : f32 to vector<8x1xf32>
    %26 = arith.maximumf %24, %25 : vector<8x1xf32>
    %c0_13 = arith.constant 0 : index
    %c0_14 = arith.constant 0 : index
    %27 = vector.load %arg4[%c0_13, %c0_14] : memref<1x32xf32, #tpu.memory_space<vmem>>, vector<1x32xf32>
    %cst_15 = arith.constant 1.000000e-07 : f32
    %28 = vector.broadcast %cst_15 : f32 to vector<8x1xf32>
    %29 = arith.addf %26, %28 : vector<8x1xf32>
    %30 = math.rsqrt %29 : vector<8x1xf32>
    %31 = vector.broadcast %27 : vector<1x32xf32> to vector<8x32xf32>
    %32 = vector.broadcast %30 : vector<8x1xf32> to vector<8x32xf32>
    %33 = arith.mulf %31, %32 : vector<8x32xf32>
    %34 = vector.broadcast %17 : vector<8x1xf32> to vector<8x32xf32>
    %35 = arith.subf %13, %34 : vector<8x32xf32>
    %36 = arith.mulf %35, %33 : vector<8x32xf32>
    %c0_16 = arith.constant 0 : index
    %c0_17 = arith.constant 0 : index
    %37 = vector.load %arg5[%c0_16, %c0_17] : memref<1x32xf32, #tpu.memory_space<vmem>>, vector<1x32xf32>
    %38 = vector.broadcast %37 : vector<1x32xf32> to vector<8x32xf32>
    %39 = arith.addf %36, %38 : vector<8x32xf32>
    %c0_18 = arith.constant 0 : index
    %c0_19 = arith.constant 0 : index
    %40 = vector.load %arg6[%c0_18, %c0_19] : memref<8x32xf32, #tpu.memory_space<vmem>>, vector<8x32xf32>
    tpu.vector_store %arg6[%c0_18, %c0_19], %39 {strides = array<i32>} : memref<8x32xf32, #tpu.memory_space<vmem>>, vector<8x32xf32>,
    return
  }
  func.func @transform_0(%arg0: i32) -> (i32, i32) {
    %c0_i32 = arith.constant 0 : i32
    %c0_i32_0 = arith.constant 0 : i32
    return %arg0, %c0_i32 : i32, i32
  }
  func.func @transform_1(%arg0: i32) -> (i32, i32) {
    %c0_i32 = arith.constant 0 : i32
    %c0_i32_0 = arith.constant 0 : i32
    %c0_i32_1 = arith.constant 0 : i32
    return %c0_i32, %c0_i32_0 : i32, i32
  }
  func.func @transform_2(%arg0: i32) -> (i32, i32) {
    %c0_i32 = arith.constant 0 : i32
    %c0_i32_0 = arith.constant 0 : i32
    %c0_i32_1 = arith.constant 0 : i32
    return %c0_i32, %c0_i32_0 : i32, i32
  }
  func.func @transform_3(%arg0: i32) -> (i32, i32) {
    %c0_i32 = arith.constant 0 : i32
    %c0_i32_0 = arith.constant 0 : i32
    %c0_i32_1 = arith.constant 0 : i32
    return %c0_i32, %c0_i32_0 : i32, i32
  }
  func.func @transform_4(%arg0: i32) -> (i32, i32) {
    %c0_i32 = arith.constant 0 : i32
    %c0_i32_0 = arith.constant 0 : i32
    %c0_i32_1 = arith.constant 0 : i32
    return %c0_i32, %c0_i32_0 : i32, i32
  }
  func.func @transform_5(%arg0: i32) -> (i32, i32) {
    %c0_i32 = arith.constant 0 : i32
    %c0_i32_0 = arith.constant 0 : i32
    return %arg0, %c0_i32 : i32, i32
  }
}

</mosaic_0001>

<bundles_post_ra>
// kernel: tpu_custom_call.1
= control target key start
LH: loop header
LB: loop body
LE: loop exit
PB: predicated region body
PF: predicated region fallthrough
CT: control target
= control target key end

     0   :  { %10 = vsyncpa [#allocation3], 0  ;;  %s960_s0 = inlined_call_operand.hbm [shape: f32[16,32], index: 0, kind: input, shape index: {}]   ;;  %s961_s1 = inlined_call_operand.hbm [shape: f32[32,32], index: 1, kind: input, shape index: {}]   ;;  %s962_s2 = inlined_call_operand.vmem [shape: f32[1,32], index: 2, kind: input, shape index: {}]   ;;  %s963_s3 = inlined_call_operand.vmem [shape: f32[1,32], index: 3, kind: input, shape index: {}]   ;;  %s964_s4 = inlined_call_operand.vmem [shape: f32[1,32], index: 4, kind: input, shape index: {}]   ;;  %s965_s5 = inlined_call_operand.hbm [shape: f32[16,32], index: 5, kind: output, shape index: {}]  }
   0x1   :  { %12 = vsyncpa [#allocation3 + $0x1], 0 }
   0x2   :  { %13 = vsyncpa [#allocation6], 0 }
   0x3   :  { %14 = vsyncpa [#allocation4], 0 }
   0x4   :  { %16 = vsyncpa [#allocation4 + $0x1], 0  ;;  %s747_s18 = smov 0   ;;  %s749_s19 = smov 0  }
   0x5   :  { %s751_s20 = smov 0   ;;  %s753_s21 = smov 0  }
   0x6 LB: > { %s768_s22 = sadd.s32 4294967295, %s707_s21   ;;  %s473_s23 = sadd.s32 4294967294, %s707_s21   ;;  %s707_s21 = sphi %s753_s21, %s985_s21   ;;  %s703_s20 = sphi %s751_s20, %s984_s20   ;;  %s699_s19 = sphi %s749_s19, %s983_s19   ;;  %s695_s18 = sphi %s747_s18, %s982_s18  }
   0x7   : > { %p42_p0 = scmp.ne.s32.totalorder %s699_s19, %s695_s18  ;;  %p966_p1 = scmp.eq.s32.totalorder %s768_s22, 0 }
   0x8   : > { %p156_p3 = scmp.eq.s32.totalorder %s473_s23, 1  ;;  %p474_p5 = scmp.ge.s32.totalorder %s707_s21, 1 }
   0x9   : > { %p777_p4 = por %p966_p1, %p42_p0  ;;  %p163_p7 = scmp.lt.s32.totalorder %s707_s21, 3 }
   0xa   : > { %p782_p6 = por %p156_p3, %p42_p0  ;;  %s709_s27 = smov [#allocation5]  }
   0xb   : > { %s969_s24 = scalar_select %p777_p4, 1, 0 }
   0xc   : > { %s970_s25 = scalar_select %p782_p6, 1, 0 }
   0xd   : > { %p787_p8 = pnand %p474_p5, %p163_p7  ;;  %s175_s28 = sshll.u32 %s709_s27, 4  ;;  %s791_s28 = int_to_ptr.vmem [resolvable:$true] %s175_s28 }
   0xe   : > { %s803_s30 = sadd.s32 1, %s707_s21   ;;  %s29_s6 = sadd.s32 1, %s703_s20 }
   0xf   : > { %s971_s26 = scalar_select %p787_p8, 1, 0 }
  0x10   : > { %p521_p9 = pneg %p787_p8  ;;  %s26_s7 = ssub.s32 %s707_s21, %s803_s30 }
  0x11   : > { %s579_s10 = scalar_lea.hbm %s961_s1, 512 }
  0x12   : > { %p798_p11 = pnand %p521_p9, %p966_p1  ;;  %p580_p12 = scmp.ne.s32.totalorder %s961_s1, %s579_s10 }
  0x13   : > { %p586_p5 = scmp.lt.u32.totalorder %s579_s10, %s961_s1 }
  0x14   : > { %p581_p13 = pneg %p798_p11 }
  0x16   : > { %p582_p0 = pnand %p581_p13, %p580_p12 }
  0x18   : > { %p583_p3 = pneg %p582_p0 }
  0x1a   : > { %p588_p7 = pnand %p586_p5, %p583_p3 }
  0x1c   : > { %591 = shalt.err (!%p588_p7)
}
  0x1d   : > { %s592_s15 = scalar_lea.vmem %s791_s28, 512  ;;  %p600_p2 = scmp.lt.s32.totalorder %s791_s28, %s791_s28 }
  0x1e   : > { %p593_p9 = scmp.ne.s32.totalorder %s791_s28, %s592_s15  ;;  %p601_p6 = scmp.lt.s32.totalorder %s592_s15, %s592_s15 }
  0x20   : > { %p595_p10 = pnand %p593_p9, %p581_p13  ;;  %p602_p4 = por %p601_p6, %p600_p2 }
  0x22   : > { %p596_p1 = pneg %p595_p10 }
  0x24   : > { %p603_p8 = pnand %p602_p4, %p596_p1 }
  0x26   : > { %606 = shalt.err (!%p603_p8)
}
  0x27   : > { %s710_s16 = smov 128   ;;  %s711_s17 = smov 8  }
  0x28   : > { %524 = dma.hbm_to_vmem [thread:$0]  (!%p798_p11), %s961_s1, 512, %s791_s28, [#allocation6], %s710_s16, %s710_s16, %s711_s17  }
  0x29   : > { %p27_p2 = scmp.eq.s32.totalorder %s26_s7, 0  ;;  %p36_p1 = scmp.ne.s32.totalorder %s703_s20, %s699_s19 }
  0x2a   : > { %p37_p4 = scmp.eq.s32.totalorder %s707_s21, 0  ;;  %p534_p6 = scmp.lt.s32.totalorder %s707_s21, 2 }
  0x2b   : > { %s834_s8 = scalar_select %p27_p2, %s703_s20, %s29_s6  }
  0x2c   : > { %p38_p8 = por %p37_p4, %p36_p1  ;;  %p973_p10 = scmp.eq.s32.totalorder %s768_s22, 1 }
  0x2d   : > { %s198_s10 = sand.u32 1, %s703_s20   ;;  %s478_s11 = sshll.u32 %s707_s21, 7 }
  0x2e   : > { %p838_p12 = por %p973_p10, %p36_p1  ;;  %s477_s12 = sshll.u32 %s198_s10, 3 }
  0x2f   : > { %s847_s14 = scalar_lea.hbm %s960_s0, %s478_s11  ;;  %s202_s28 = scalar_lea.vmem [#allocation2], %s477_s12 }
  0x30   : > { %s209_s6 = sshll.u32 %s202_s28, 4  ;;  %p849_p11 = pnand %p534_p6, %p38_p8  ;;  %s853_s6 = int_to_ptr.vmem [resolvable:$true] %s209_s6 }
  0x31   : > { %s199_s15 = scalar_lea.sflag [#allocation3], %s198_s10  ;;  %s607_s16 = scalar_lea.hbm %s847_s14, 128 }
  0x32   : > { %p608_p13 = scmp.ne.s32.totalorder %s847_s14, %s607_s16  ;;  %p609_p0 = pneg %p849_p11 }
  0x33   : > { %s612_s27 = scalar_lea.hbm %s960_s0, 256  ;;  %p613_p7 = scmp.lt.u32.totalorder %s847_s14, %s960_s0 }
  0x34   : > { %p610_p3 = pnand %p609_p0, %p608_p13  ;;  %p614_p9 = scmp.lt.u32.totalorder %s612_s27, %s607_s16 }
  0x35   : > { %p616_p1 = scmp.lt.u32.totalorder %s607_s16, %s847_s14 }
  0x36   : > { %p611_p5 = pneg %p610_p3  ;;  %p615_p2 = por %p614_p9, %p613_p7 }
  0x38   : > { %p617_p4 = por %p616_p1, %p615_p2 }
  0x3a   : > { %p618_p6 = pnand %p617_p4, %p611_p5 }
  0x3c   : > { %621 = shalt.err (!%p618_p6)
}
  0x3d   : > { %s622_s10 = scalar_lea.vmem %s853_s6, 128  ;;  %s712_s29 = smov [#allocation2]  }
  0x3e   : > { %p623_p8 = scmp.ne.s32.totalorder %s853_s6, %s622_s10  ;;  %s627_s13 = sshll.u32 %s712_s29, 4  ;;  %s628_s13 = int_to_ptr.vmem [resolvable:$false] %s627_s13 }
  0x3f   : > { %s629_s28 = scalar_lea.vmem %s628_s13, 256  ;;  %p630_p3 = scmp.lt.s32.totalorder %s853_s6, %s628_s13 }
  0x40   : > { %p625_p10 = pnand %p623_p8, %p609_p0  ;;  %p631_p7 = scmp.lt.s32.totalorder %s629_s28, %s622_s10 }
  0x42   : > { %p626_p13 = pneg %p625_p10  ;;  %p632_p9 = por %p631_p7, %p630_p3 }
  0x44   : > { %p633_p2 = pnand %p632_p9, %p626_p13 }
  0x46   : > { %636 = shalt.err (!%p633_p2)
}
  0x47   : > { %528 = dma.hbm_to_vmem [thread:$0]  (!%p849_p11), %s847_s14, 128, %s853_s6, %s199_s15  }
  0x48   : > { %p976_p5 = scmp.ne.s32.totalorder %s971_s26, 0 }
  0x49   : > { %s883_s16 = sand.u32 (!%p976_p5), 1, %s699_s19   ;;  %p977_p0 = scmp.ne.s32.totalorder (!%p976_p5), %s969_s24, 0 }
  0x4a   : > { %218 = sbr.rel (%p976_p5) target bundleno = 512 (0x200), region = 40  ;;  %s480_s17 = sshll.u32 (!%p976_p5), %s883_s16, 3 }
  0x4b   : > { %s221_s23 = scalar_lea.sflag (!%p976_p5), [#allocation3], %s883_s16  ;;  %s224_s27 = scalar_lea.vmem (!%p976_p5), [#allocation2], %s480_s17 }
  0x51   : > { %682 = dma.done.wait (%p977_p0), %s221_s23, 128  }
  0x52   : > { %684 = vsyncadd (%p977_p0), %s221_s23, 4294967168  ;;  %p978_p11 = scmp.eq.s32.totalorder %s768_s22, 0 }
  0x54   : > { %686 = dma.done.wait (%p978_p11), [#allocation6], 512   ;;  %p979_p1 = pmov %p978_p11 }
  0x55   : > { %v713_v0 = vmov 0.0|0.0   ;;  %vm714_vm0 = vmmov 0   ;;  %v715_v1 = vmov 0.0   ;;  %v256_v2 = vld [vmem:[#allocation5] sm:$0xff]  ;;  %v257_v3 = vld [vmem:[#allocation5 + $0x8] sm:$0xff]  ;;  %v258_v4 = vld [vmem:[#allocation5 + $0x10] sm:$0xff] }
  0x56   : > { %688 = vsyncadd (%p979_p1), [#allocation6], 4294966784  ;;  %507 = vmatprep.subr.bf16.mxu0 %v713_v0  ;;  %504 = vmatprep.mubr.msk.f32.mxu0 %vm714_vm0, %v715_v1  ;;  %v508_v5 = vpack.c.bf16 %v257_v3, %v256_v2  ;;  %v259_v6 = vld [vmem:[#allocation5 + $0x18] sm:$0xff]  ;;  %vm267_vm1 = vcmask 261120   ;;  %v483_v9 = vld [vmem:[%s962_s2] ss:$0 sm:$0xff] }
  0x57   : > { %v511_v7 = vpack.c.bf16 %v259_v6, %v258_v4  ;;  %v255_v8 = vld [vmem:[%s224_s27] sm:$0xff]  ;;  %s488_s11 = sshll.u32 %s768_s22, 7  ;;  %s254_s12 = scalar_lea.vmem [#allocation7], %s480_s17 }
  0x58   : > { %509 = vmatpush3.bf16.msra.mxu0 %v508_v5  ;;  %v485_v29 = vld [vmem:[%s963_s3] ss:$0 sm:$0xff]  ;;  %s393_s10 = sshll.u32 %s254_s12, 4  ;;  %s915_s28 = scalar_lea.hbm %s965_s5, %s488_s11  ;;  %s917_s10 = int_to_ptr.vmem [resolvable:$true] %s393_s10 }
  0x59   : > { %510 = vmatprep.subr.bf16.mxu0 %v713_v0  ;;  %v486_v33 = vld [vmem:[%s964_s4] ss:$0 sm:$0xff]  ;;  %s380_s23 = scalar_lea.sflag [#allocation4], %s883_s16  ;;  %s637_s27 = scalar_lea.vmem %s917_s10, 128 }
  0x5a   : > { %p638_p4 = scmp.ne.s32.totalorder %s917_s10, %s637_s27  ;;  %s716_s22 = smov [#allocation7]  }
  0x5b   : > { %s641_s17 = sshll.u32 %s716_s22, 4  ;;  %s642_s17 = int_to_ptr.vmem [resolvable:$false] %s641_s17 }
  0x5c   : > { %512 = vmatpush3.bf16.msra.mxu0 %v511_v7  ;;  %p639_p6 = pnand %p638_p4, %p838_p12  ;;  %s643_s24 = scalar_lea.vmem %s642_s17, 256 }
  0x5d   : > { %p644_p10 = scmp.lt.s32.totalorder %s917_s10, %s642_s17  ;;  %p645_p13 = scmp.lt.s32.totalorder %s643_s24, %s637_s27 }
  0x5e   : > { %p640_p8 = pneg %p639_p6 }
  0x5f   : > { %505 = vmatmul.mubr.msk.f32.vlgmr.msra.gmra.mrb[0].mxu0 %vm267_vm1, %v255_v8  ;;  %p646_p3 = por %p645_p13, %p644_p10 }
  0x61   : > { %p647_p7 = pnand %p646_p3, %p640_p8 }
 0x132   : > { %v337_v10 = vpop.f32.mrb[0].mxu0 }
 0x133   : > { %v338_v11 = vadd.f32 %v483_v9, %v337_v10  ;;  %v506_v12 = vpop.f32.mrb[1].mxu0 }
 0x135   : > { %v342_v13 = vmul.f32 0.70710677, %v338_v11  ;;  %v341_v15 = vmul.f32 0.5, %v338_v11 }
 0x137   : > { %575 = verf.f32 %v342_v13 }
 0x141   : > { %v576_v14 = vpop.eup %575 }
 0x142   : > { %v344_v16 = vadd.f32 1.0, %v576_v14 }
 0x144   : > { %v345_v17 = vmul.f32 %v344_v16, %v341_v15 }
 0x146   : > { %v346_v18 = vsel %vm267_vm1, %v345_v17, 0.0  ;;  %v350_v19 = vmul.f32 %v345_v17, %v345_v17 }
 0x147   : > { %347 = vadd.xlane.f32.xlu0 %v346_v18 }
 0x148   : > { %v351_v20 = vsel %vm267_vm1, %v350_v19, 0.0 }
 0x14b   : > { %352 = vadd.xlane.f32.xlu0 %v351_v20 }
 0x1d4   : > { %v348_v21 = vpop.xlane.xlu0 %347 }
 0x1d5   : > { %v349_v22 = vmul.f32 0.03125, %v348_v21 }
 0x1d7   : > { %v355_v24 = vmul.f32 %v349_v22, %v349_v22  ;;  %v368_v31 = vsub.f32 %v345_v17, %v349_v22 }
 0x1d8   : > { %v353_v23 = vpop.xlane.xlu0 %352 }
 0x1d9   : > { %v354_v25 = vmul.f32 0.03125, %v353_v23 }
 0x1db   : > { %v356_v26 = vsub.f32 %v354_v25, %v355_v24 }
 0x1dd   : > { %v357_v27 = vmax.f32 %v356_v26, 0.0 }
 0x1df   : > { %v359_v28 = vadd.f32 1e-07, %v357_v27 }
 0x1e1   : > { %577 = vrsqrt.f32 %v359_v28 }
 0x1eb   : > { %v578_v30 = vpop.eup %577 }
 0x1ec   : > { %v367_v32 = vmul.f32 %v578_v30, %v485_v29 }
 0x1ee   : > { %v369_v34 = vmul.f32 %v368_v31, %v367_v32 }
 0x1f0   : > { %v377_v35 = vadd.f32 %v486_v33, %v369_v34 }
 0x1f2   : > { %378 = vst.msk [vmem:[%s254_s12] sm:$0xff] %vm267_vm1, %v377_v35 }
 0x1f3   : > { %650 = shalt.err (!%p647_p7)
}
 0x1f4   : > { %s651_s16 = scalar_lea.hbm %s915_s28, 128  ;;  %s655_s6 = scalar_lea.hbm %s965_s5, 256 }
 0x1f5   : > { %p652_p9 = scmp.ne.s32.totalorder %s915_s28, %s651_s16  ;;  %p656_p0 = scmp.lt.u32.totalorder %s915_s28, %s965_s5 }
 0x1f6   : > { %p657_p11 = scmp.lt.u32.totalorder %s655_s6, %s651_s16  ;;  %p659_p4 = scmp.lt.u32.totalorder %s651_s16, %s915_s28 }
 0x1f7   : > { %p653_p2 = pnand %p652_p9, %p838_p12 }
 0x1f8   : > { %p658_p1 = por %p657_p11, %p656_p0 }
 0x1f9   : > { %p654_p5 = pneg %p653_p2 }
 0x1fa   : > { %p660_p6 = por %p659_p4, %p658_p1 }
 0x1fc   : > { %p661_p8 = pnand %p660_p6, %p654_p5 }
 0x1fe   : > { %664 = shalt.err (!%p661_p8)
}
 0x1ff   : > { %519 = dma.vmem_to_hbm [thread:$0]  (%p838_p12), %s917_s10, 128, %s915_s28, %s380_s23  }
 0x200 PF: > { %s405_s11 = sand.u32 1, %s695_s18   ;;  %p980_p10 = scmp.ne.s32.totalorder %s970_s25, 0 }
 0x201   : > { %p981_p13 = scmp.ge.s32.totalorder %s707_s21, 2  ;;  %s406_s12 = scalar_lea.sflag [#allocation4], %s405_s11 }
 0x203   : > { %p530_p3 = pnand %p981_p13, %p980_p10 }
 0x205   : > { %690 = dma.done.wait (!%p530_p3), %s406_s12, 128  }
 0x206   : > { %692 = vsyncadd (!%p530_p3), %s406_s12, 4294967168  ;;  %p19_p7 = scmp.ge.s32.totalorder %s803_s30, 4   ;;  %s982_s18 = smov %s699_s19 }
 0x207   : > { %s983_s19 = smov %s703_s20  ;;  %s984_s20 = smov %s834_s8 }
 0x208   : > { %s985_s21 = smov %s803_s30  ;;  %21 = sbr.rel (!%p19_p7) target bundleno = 6 (0x6), region = 89 }
 0x20f   :  { %411 = vsyncpa [#allocation3], 1 }
 0x210   :  { %413 = vsyncpa [#allocation3 + $0x1], 1 }
 0x211   :  { %414 = vsyncpa [#allocation6], 1 }
 0x212   :  { %415 = vsyncpa [#allocation4], 1 }
 0x213   :  { %417 = vsyncpa [#allocation4 + $0x1], 1 }

// kernel: tpu_custom_call.1
= control target key start
LH: loop header
LB: loop body
LE: loop exit
PB: predicated region body
PF: predicated region fallthrough
CT: control target
= control target key end

     0   :  { %10 = vsyncpa [#allocation3], 0  ;;  %s960_s0 = inlined_call_operand.hbm [shape: f32[16,32], index: 0, kind: input, shape index: {}]   ;;  %s961_s1 = inlined_call_operand.hbm [shape: f32[32,32], index: 1, kind: input, shape index: {}]   ;;  %s962_s2 = inlined_call_operand.vmem [shape: f32[1,32], index: 2, kind: input, shape index: {}]   ;;  %s963_s3 = inlined_call_operand.vmem [shape: f32[1,32], index: 3, kind: input, shape index: {}]   ;;  %s964_s4 = inlined_call_operand.vmem [shape: f32[1,32], index: 4, kind: input, shape index: {}]   ;;  %s965_s5 = inlined_call_operand.hbm [shape: f32[16,32], index: 5, kind: output, shape index: {}]  }
   0x1   :  { %12 = vsyncpa [#allocation3 + $0x1], 0 }
   0x2   :  { %13 = vsyncpa [#allocation6], 0 }
   0x3   :  { %14 = vsyncpa [#allocation4], 0 }
   0x4   :  { %16 = vsyncpa [#allocation4 + $0x1], 0  ;;  %s747_s18 = smov 0   ;;  %s749_s19 = smov 0  }
   0x5   :  { %s751_s20 = smov 0   ;;  %s753_s21 = smov 0  }
   0x6 LB: > { %s768_s22 = sadd.s32 4294967295, %s707_s21   ;;  %s473_s23 = sadd.s32 4294967294, %s707_s21   ;;  %s707_s21 = sphi %s753_s21, %s985_s21   ;;  %s703_s20 = sphi %s751_s20, %s984_s20   ;;  %s699_s19 = sphi %s749_s19, %s983_s19   ;;  %s695_s18 = sphi %s747_s18, %s982_s18  }
   0x7   : > { %p42_p0 = scmp.ne.s32.totalorder %s699_s19, %s695_s18  ;;  %p966_p1 = scmp.eq.s32.totalorder %s768_s22, 0 }
   0x8   : > { %p156_p3 = scmp.eq.s32.totalorder %s473_s23, 1  ;;  %p474_p5 = scmp.ge.s32.totalorder %s707_s21, 1 }
   0x9   : > { %p777_p4 = por %p966_p1, %p42_p0  ;;  %p163_p7 = scmp.lt.s32.totalorder %s707_s21, 3 }
   0xa   : > { %p782_p6 = por %p156_p3, %p42_p0  ;;  %s709_s27 = smov [#allocation5]  }
   0xb   : > { %s969_s24 = scalar_select %p777_p4, 1, 0 }
   0xc   : > { %s970_s25 = scalar_select %p782_p6, 1, 0 }
   0xd   : > { %p787_p8 = pnand %p474_p5, %p163_p7  ;;  %s175_s28 = sshll.u32 %s709_s27, 4  ;;  %s791_s28 = int_to_ptr.vmem [resolvable:$true] %s175_s28 }
   0xe   : > { %s803_s30 = sadd.s32 1, %s707_s21   ;;  %s29_s6 = sadd.s32 1, %s703_s20 }
   0xf   : > { %s971_s26 = scalar_select %p787_p8, 1, 0 }
  0x10   : > { %p521_p9 = pneg %p787_p8  ;;  %s26_s7 = ssub.s32 %s707_s21, %s803_s30 }
  0x11   : > { %s579_s10 = scalar_lea.hbm %s961_s1, 512 }
  0x12   : > { %p798_p11 = pnand %p521_p9, %p966_p1  ;;  %p580_p12 = scmp.ne.s32.totalorder %s961_s1, %s579_s10 }
  0x13   : > { %p586_p5 = scmp.lt.u32.totalorder %s579_s10, %s961_s1 }
  0x14   : > { %p581_p13 = pneg %p798_p11 }
  0x16   : > { %p582_p0 = pnand %p581_p13, %p580_p12 }
  0x18   : > { %p583_p3 = pneg %p582_p0 }
  0x1a   : > { %p588_p7 = pnand %p586_p5, %p583_p3 }
  0x1c   : > { %591 = shalt.err (!%p588_p7)
}
  0x1d   : > { %s592_s15 = scalar_lea.vmem %s791_s28, 512  ;;  %p600_p2 = scmp.lt.s32.totalorder %s791_s28, %s791_s28 }
  0x1e   : > { %p593_p9 = scmp.ne.s32.totalorder %s791_s28, %s592_s15  ;;  %p601_p6 = scmp.lt.s32.totalorder %s592_s15, %s592_s15 }
  0x20   : > { %p595_p10 = pnand %p593_p9, %p581_p13  ;;  %p602_p4 = por %p601_p6, %p600_p2 }
  0x22   : > { %p596_p1 = pneg %p595_p10 }
  0x24   : > { %p603_p8 = pnand %p602_p4, %p596_p1 }
  0x26   : > { %606 = shalt.err (!%p603_p8)
}
  0x27   : > { %s710_s16 = smov 128   ;;  %s711_s17 = smov 8  }
  0x28   : > { %524 = dma.hbm_to_vmem [thread:$0]  (!%p798_p11), %s961_s1, 512, %s791_s28, [#allocation6], %s710_s16, %s710_s16, %s711_s17  }
  0x29   : > { %p27_p2 = scmp.eq.s32.totalorder %s26_s7, 0  ;;  %p36_p1 = scmp.ne.s32.totalorder %s703_s20, %s699_s19 }
  0x2a   : > { %p37_p4 = scmp.eq.s32.totalorder %s707_s21, 0  ;;  %p534_p6 = scmp.lt.s32.totalorder %s707_s21, 2 }
  0x2b   : > { %s834_s8 = scalar_select %p27_p2, %s703_s20, %s29_s6  }
  0x2c   : > { %p38_p8 = por %p37_p4, %p36_p1  ;;  %p973_p10 = scmp.eq.s32.totalorder %s768_s22, 1 }
  0x2d   : > { %s198_s10 = sand.u32 1, %s703_s20   ;;  %s478_s11 = sshll.u32 %s707_s21, 7 }
  0x2e   : > { %p838_p12 = por %p973_p10, %p36_p1  ;;  %s477_s12 = sshll.u32 %s198_s10, 3 }
  0x2f   : > { %s847_s14 = scalar_lea.hbm %s960_s0, %s478_s11  ;;  %s202_s28 = scalar_lea.vmem [#allocation2], %s477_s12 }
  0x30   : > { %s209_s6 = sshll.u32 %s202_s28, 4  ;;  %p849_p11 = pnand %p534_p6, %p38_p8  ;;  %s853_s6 = int_to_ptr.vmem [resolvable:$true] %s209_s6 }
  0x31   : > { %s199_s15 = scalar_lea.sflag [#allocation3], %s198_s10  ;;  %s607_s16 = scalar_lea.hbm %s847_s14, 128 }
  0x32   : > { %p608_p13 = scmp.ne.s32.totalorder %s847_s14, %s607_s16  ;;  %p609_p0 = pneg %p849_p11 }
  0x33   : > { %s612_s27 = scalar_lea.hbm %s960_s0, 256  ;;  %p613_p7 = scmp.lt.u32.totalorder %s847_s14, %s960_s0 }
  0x34   : > { %p610_p3 = pnand %p609_p0, %p608_p13  ;;  %p614_p9 = scmp.lt.u32.totalorder %s612_s27, %s607_s16 }
  0x35   : > { %p616_p1 = scmp.lt.u32.totalorder %s607_s16, %s847_s14 }
  0x36   : > { %p611_p5 = pneg %p610_p3  ;;  %p615_p2 = por %p614_p9, %p613_p7 }
  0x38   : > { %p617_p4 = por %p616_p1, %p615_p2 }
  0x3a   : > { %p618_p6 = pnand %p617_p4, %p611_p5 }
  0x3c   : > { %621 = shalt.err (!%p618_p6)
}
  0x3d   : > { %s622_s10 = scalar_lea.vmem %s853_s6, 128  ;;  %s712_s29 = smov [#allocation2]  }
  0x3e   : > { %p623_p8 = scmp.ne.s32.totalorder %s853_s6, %s622_s10  ;;  %s627_s13 = sshll.u32 %s712_s29, 4  ;;  %s628_s13 = int_to_ptr.vmem [resolvable:$false] %s627_s13 }
  0x3f   : > { %s629_s28 = scalar_lea.vmem %s628_s13, 256  ;;  %p630_p3 = scmp.lt.s32.totalorder %s853_s6, %s628_s13 }
  0x40   : > { %p625_p10 = pnand %p623_p8, %p609_p0  ;;  %p631_p7 = scmp.lt.s32.totalorder %s629_s28, %s622_s10 }
  0x42   : > { %p626_p13 = pneg %p625_p10  ;;  %p632_p9 = por %p631_p7, %p630_p3 }
  0x44   : > { %p633_p2 = pnand %p632_p9, %p626_p13 }
  0x46   : > { %636 = shalt.err (!%p633_p2)
}
  0x47   : > { %528 = dma.hbm_to_vmem [thread:$0]  (!%p849_p11), %s847_s14, 128, %s853_s6, %s199_s15  }
  0x48   : > { %p976_p5 = scmp.ne.s32.totalorder %s971_s26, 0 }
  0x49   : > { %s883_s16 = sand.u32 (!%p976_p5), 1, %s699_s19   ;;  %p977_p0 = scmp.ne.s32.totalorder (!%p976_p5), %s969_s24, 0 }
  0x4a   : > { %218 = sbr.rel (%p976_p5) target bundleno = 512 (0x200), region = 40  ;;  %s480_s17 = sshll.u32 (!%p976_p5), %s883_s16, 3 }
  0x4b   : > { %s221_s23 = scalar_lea.sflag (!%p976_p5), [#allocation3], %s883_s16  ;;  %s224_s27 = scalar_lea.vmem (!%p976_p5), [#allocation2], %s480_s17 }
  0x51   : > { %682 = dma.done.wait (%p977_p0), %s221_s23, 128  }
  0x52   : > { %684 = vsyncadd (%p977_p0), %s221_s23, 4294967168  ;;  %p978_p11 = scmp.eq.s32.totalorder %s768_s22, 0 }
  0x54   : > { %686 = dma.done.wait (%p978_p11), [#allocation6], 512   ;;  %p979_p1 = pmov %p978_p11 }
  0x55   : > { %v713_v0 = vmov 0.0|0.0   ;;  %vm714_vm0 = vmmov 0   ;;  %v715_v1 = vmov 0.0   ;;  %v256_v2 = vld [vmem:[#allocation5] sm:$0xff]  ;;  %v257_v3 = vld [vmem:[#allocation5 + $0x8] sm:$0xff]  ;;  %v258_v4 = vld [vmem:[#allocation5 + $0x10] sm:$0xff] }
  0x56   : > { %688 = vsyncadd (%p979_p1), [#allocation6], 4294966784  ;;  %507 = vmatprep.subr.bf16.mxu0 %v713_v0  ;;  %504 = vmatprep.mubr.msk.f32.mxu0 %vm714_vm0, %v715_v1  ;;  %v508_v5 = vpack.c.bf16 %v257_v3, %v256_v2  ;;  %v259_v6 = vld [vmem:[#allocation5 + $0x18] sm:$0xff]  ;;  %vm267_vm1 = vcmask 261120   ;;  %v483_v9 = vld [vmem:[%s962_s2] ss:$0 sm:$0xff] }
  0x57   : > { %v511_v7 = vpack.c.bf16 %v259_v6, %v258_v4  ;;  %v255_v8 = vld [vmem:[%s224_s27] sm:$0xff]  ;;  %s488_s11 = sshll.u32 %s768_s22, 7  ;;  %s254_s12 = scalar_lea.vmem [#allocation7], %s480_s17 }
  0x58   : > { %509 = vmatpush3.bf16.msra.mxu0 %v508_v5  ;;  %v485_v29 = vld [vmem:[%s963_s3] ss:$0 sm:$0xff]  ;;  %s393_s10 = sshll.u32 %s254_s12, 4  ;;  %s915_s28 = scalar_lea.hbm %s965_s5, %s488_s11  ;;  %s917_s10 = int_to_ptr.vmem [resolvable:$true] %s393_s10 }
  0x59   : > { %510 = vmatprep.subr.bf16.mxu0 %v713_v0  ;;  %v486_v33 = vld [vmem:[%s964_s4] ss:$0 sm:$0xff]  ;;  %s380_s23 = scalar_lea.sflag [#allocation4], %s883_s16  ;;  %s637_s27 = scalar_lea.vmem %s917_s10, 128 }
  0x5a   : > { %p638_p4 = scmp.ne.s32.totalorder %s917_s10, %s637_s27  ;;  %s716_s22 = smov [#allocation7]  }
  0x5b   : > { %s641_s17 = sshll.u32 %s716_s22, 4  ;;  %s642_s17 = int_to_ptr.vmem [resolvable:$false] %s641_s17 }
  0x5c   : > { %512 = vmatpush3.bf16.msra.mxu0 %v511_v7  ;;  %p639_p6 = pnand %p638_p4, %p838_p12  ;;  %s643_s24 = scalar_lea.vmem %s642_s17, 256 }
  0x5d   : > { %p644_p10 = scmp.lt.s32.totalorder %s917_s10, %s642_s17  ;;  %p645_p13 = scmp.lt.s32.totalorder %s643_s24, %s637_s27 }
  0x5e   : > { %p640_p8 = pneg %p639_p6 }
  0x5f   : > { %505 = vmatmul.mubr.msk.f32.vlgmr.msra.gmra.mrb[0].mxu0 %vm267_vm1, %v255_v8  ;;  %p646_p3 = por %p645_p13, %p644_p10 }
  0x61   : > { %p647_p7 = pnand %p646_p3, %p640_p8 }
 0x132   : > { %v337_v10 = vpop.f32.mrb[0].mxu0 }
 0x133   : > { %v338_v11 = vadd.f32 %v483_v9, %v337_v10  ;;  %v506_v12 = vpop.f32.mrb[1].mxu0 }
 0x135   : > { %v342_v13 = vmul.f32 0.70710677, %v338_v11  ;;  %v341_v15 = vmul.f32 0.5, %v338_v11 }
 0x137   : > { %575 = verf.f32 %v342_v13 }
 0x141   : > { %v576_v14 = vpop.eup %575 }
 0x142   : > { %v344_v16 = vadd.f32 1.0, %v576_v14 }
 0x144   : > { %v345_v17 = vmul.f32 %v344_v16, %v341_v15 }
 0x146   : > { %v346_v18 = vsel %vm267_vm1, %v345_v17, 0.0  ;;  %v350_v19 = vmul.f32 %v345_v17, %v345_v17 }
 0x147   : > { %347 = vadd.xlane.f32.xlu0 %v346_v18 }
 0x148   : > { %v351_v20 = vsel %vm267_vm1, %v350_v19, 0.0 }
 0x14b   : > { %352 = vadd.xlane.f32.xlu0 %v351_v20 }
 0x1d4   : > { %v348_v21 = vpop.xlane.xlu0 %347 }
 0x1d5   : > { %v349_v22 = vmul.f32 0.03125, %v348_v21 }
 0x1d7   : > { %v355_v24 = vmul.f32 %v349_v22, %v349_v22  ;;  %v368_v31 = vsub.f32 %v345_v17, %v349_v22 }
 0x1d8   : > { %v353_v23 = vpop.xlane.xlu0 %352 }
 0x1d9   : > { %v354_v25 = vmul.f32 0.03125, %v353_v23 }
 0x1db   : > { %v356_v26 = vsub.f32 %v354_v25, %v355_v24 }
 0x1dd   : > { %v357_v27 = vmax.f32 %v356_v26, 0.0 }
 0x1df   : > { %v359_v28 = vadd.f32 1e-07, %v357_v27 }
 0x1e1   : > { %577 = vrsqrt.f32 %v359_v28 }
 0x1eb   : > { %v578_v30 = vpop.eup %577 }
 0x1ec   : > { %v367_v32 = vmul.f32 %v578_v30, %v485_v29 }
 0x1ee   : > { %v369_v34 = vmul.f32 %v368_v31, %v367_v32 }
 0x1f0   : > { %v377_v35 = vadd.f32 %v486_v33, %v369_v34 }
 0x1f2   : > { %378 = vst.msk [vmem:[%s254_s12] sm:$0xff] %vm267_vm1, %v377_v35 }
 0x1f3   : > { %650 = shalt.err (!%p647_p7)
}
 0x1f4   : > { %s651_s16 = scalar_lea.hbm %s915_s28, 128  ;;  %s655_s6 = scalar_lea.hbm %s965_s5, 256 }
 0x1f5   : > { %p652_p9 = scmp.ne.s32.totalorder %s915_s28, %s651_s16  ;;  %p656_p0 = scmp.lt.u32.totalorder %s915_s28, %s965_s5 }
 0x1f6   : > { %p657_p11 = scmp.lt.u32.totalorder %s655_s6, %s651_s16  ;;  %p659_p4 = scmp.lt.u32.totalorder %s651_s16, %s915_s28 }
 0x1f7   : > { %p653_p2 = pnand %p652_p9, %p838_p12 }
 0x1f8   : > { %p658_p1 = por %p657_p11, %p656_p0 }
 0x1f9   : > { %p654_p5 = pneg %p653_p2 }
 0x1fa   : > { %p660_p6 = por %p659_p4, %p658_p1 }
 0x1fc   : > { %p661_p8 = pnand %p660_p6, %p654_p5 }
 0x1fe   : > { %664 = shalt.err (!%p661_p8)
}
 0x1ff   : > { %519 = dma.vmem_to_hbm [thread:$0]  (%p838_p12), %s917_s10, 128, %s915_s28, %s380_s23  }
 0x200 PF: > { %s405_s11 = sand.u32 1, %s695_s18   ;;  %p980_p10 = scmp.ne.s32.totalorder %s970_s25, 0 }
 0x201   : > { %p981_p13 = scmp.ge.s32.totalorder %s707_s21, 2  ;;  %s406_s12 = scalar_lea.sflag [#allocation4], %s405_s11 }
 0x203   : > { %p530_p3 = pnand %p981_p13, %p980_p10 }
 0x205   : > { %690 = dma.done.wait (!%p530_p3), %s406_s12, 128  }
 0x206   : > { %692 = vsyncadd (!%p530_p3), %s406_s12, 4294967168  ;;  %p19_p7 = scmp.ge.s32.totalorder %s803_s30, 4   ;;  %s982_s18 = smov %s699_s19 }
 0x207   : > { %s983_s19 = smov %s703_s20  ;;  %s984_s20 = smov %s834_s8 }
 0x208   : > { %s985_s21 = smov %s803_s30  ;;  %21 = sbr.rel (!%p19_p7) target bundleno = 6 (0x6), region = 89 }
 0x20f   :  { %411 = vsyncpa [#allocation3], 1 }
 0x210   :  { %413 = vsyncpa [#allocation3 + $0x1], 1 }
 0x211   :  { %414 = vsyncpa [#allocation6], 1 }
 0x212   :  { %415 = vsyncpa [#allocation4], 1 }
 0x213   :  { %417 = vsyncpa [#allocation4 + $0x1], 1 }

</bundles_post_ra>
